<compile_context>
chip_gen: v7x
topology: tpu7x:2x2x1
jax: 0.10.0
libtpu: 0.0.40
codegen_flags: <defaults>
</compile_context>

<pallas_src>
import jax
import jax.numpy as jnp
from jax.experimental import pallas as pl
from jax.experimental.pallas import tpu as pltpu


# ---------------------------------------------------------------------------
# Fused single-pass kernel: pool -> fc1 -> PReLU -> fc2 -> sigmoid -> rescale
# ---------------------------------------------------------------------------
def se_block_kernel(x_ref, w1t_ref, b1_ref, alpha_ref, w2t_ref, b2_ref, o_ref):
    bblk, C, HW = x_ref.shape
    x = x_ref[...]                                               # (bblk, C, HW)

    # --- squeeze: global average pool on the (otherwise idle) MXU ----------
    ones_q = jnp.ones((bblk, 1, HW), dtype=x.dtype)
    pooled = jnp.einsum("bqh,bch->bqc", ones_q, x,
                        preferred_element_type=jnp.float32)      # (bblk, 1, C)
    pooled = pooled.reshape(bblk, C) * jnp.float32(1.0 / HW)     # (bblk, C)

    # --- excitation MLP (f32 accumulation), batched over the bblk rows -----
    h = jnp.dot(pooled, w1t_ref[...],
                preferred_element_type=jnp.float32) + b1_ref[...]   # (bblk, Cr)
    a = alpha_ref[0]                               # PReLU slope (scalar, SMEM)
    h = jnp.where(h > 0, h, a * h)
    g = jnp.dot(h, w2t_ref[...],
                preferred_element_type=jnp.float32) + b2_ref[...]   # (bblk, C)
    g = jax.nn.sigmoid(g)

    # --- scale: broadcast gate over the spatial lanes. Tiny lane->sublane
    # relayout of g (bblk*C elems) is accepted; store path stays one vmul +
    # one vst per vreg (v5e has a single vst slot).
    o_ref[...] = (x * g[:, :, None].astype(x.dtype)).astype(o_ref.dtype)


# ---------------------------------------------------------------------------
# Channel-split fallback (two passes) for huge per-image feature maps
# ---------------------------------------------------------------------------
def se_pool_kernel(x_ref, pooled_ref):
    # x block: (bblk, cblk, HW) -> pooled block (bblk, cblk, 1), f32.
    pooled_ref[...] = jnp.mean(x_ref[...].astype(jnp.float32),
                               axis=2, keepdims=True)


def se_scale_kernel(x_ref, g_ref, o_ref):
    x = x_ref[...]
    o_ref[...] = (x * g_ref[...].astype(x.dtype)).astype(o_ref.dtype)


# ---------------------------------------------------------------------------
# Tiling helpers
# ---------------------------------------------------------------------------
def _choose_bblk(B, C, HW, itemsize, target_bytes):
    """Largest divisor of B whose x-tile fits `target_bytes`, preferring
    >= 4 (and even) grid steps so the DMA pipeline has iterations to overlap
    and both v7x TensorCores get pipelined work. Returns None if even a
    single image does not fit the target."""
    divisors = [d for d in range(1, B + 1) if B % d == 0]
    fits = [d for d in divisors if d * C * HW * itemsize <= target_bytes]
    if not fits:
        return None
    for pred in (lambda d: B // d >= 4 and (B // d) % 2 == 0,
                 lambda d: B // d >= 4,
                 lambda d: B // d >= 2,
                 lambda d: True):
        cand = [d for d in fits if pred(d)]
        if cand:
            return max(cand)
    return 1


def _choose_cblk(C, HW, itemsize, target_bytes):
    """Channel block for the split path: largest multiple-of-8 divisor of C
    whose (cblk, HW) tile fits `target_bytes`."""
    cands = [d for d in range(8, C + 1, 8) if C % d == 0]
    if not cands:
        cands = [d for d in range(1, C + 1) if C % d == 0]
    fits = [d for d in cands if d * HW * itemsize <= target_bytes]
    return max(fits) if fits else min(cands)


def _vmem_cap_bytes():
    """~75% of physical VMEM: 48 MiB on v7x, 96 MiB on v5e/v6e."""
    try:
        phys = int(pltpu.get_tpu_info().vmem_capacity_bytes)
    except Exception:
        phys = 64 << 20          # conservative (v7x per-core size)
    return (phys * 3) // 4


# ---------------------------------------------------------------------------
# Wrappers
# ---------------------------------------------------------------------------
def _se_block_split(xr, w1, b1, alpha, w2, b2, *, cblk, vmem_limit):
    """Two-pass path: pool kernel -> tiny MLP in plain JAX -> rescale kernel.
    Used when one image's (C, HW) slab cannot be double-buffered in VMEM."""
    B, C, HW = xr.shape
    itemsize = xr.dtype.itemsize
    grid = (B, C // cblk)

    pooled = pl.pallas_call(
        se_pool_kernel,
        out_shape=jax.ShapeDtypeStruct((B, C, 1), jnp.float32),
        grid=grid,
        in_specs=[pl.BlockSpec((1, cblk, HW), lambda b, c: (b, c, 0))],
        out_specs=pl.BlockSpec((1, cblk, 1), lambda b, c: (b, c, 0)),
        compiler_params=pltpu.CompilerParams(
            dimension_semantics=("parallel", "parallel"),
            vmem_limit_bytes=vmem_limit),
        cost_estimate=pl.CostEstimate(
            flops=B * C * HW, transcendentals=0,
            bytes_accessed=B * C * HW * itemsize + B * C * 4),
    )(xr)

    # Excitation MLP on the tiny (B, C) pooled tensor in plain JAX.
    y = pooled.reshape(B, C)
    h = y @ w1.T + b1
    h = jnp.where(h > 0, h, alpha[0] * h)
    g = jax.nn.sigmoid(h @ w2.T + b2)
    g3 = g.reshape(B, C, 1).astype(jnp.float32)

    out = pl.pallas_call(
        se_scale_kernel,
        out_shape=jax.ShapeDtypeStruct((B, C, HW), xr.dtype),
        grid=grid,
        in_specs=[pl.BlockSpec((1, cblk, HW), lambda b, c: (b, c, 0)),
                  pl.BlockSpec((1, cblk, 1), lambda b, c: (b, c, 0))],
        out_specs=pl.BlockSpec((1, cblk, HW), lambda b, c: (b, c, 0)),
        compiler_params=pltpu.CompilerParams(
            dimension_semantics=("parallel", "parallel"),
            vmem_limit_bytes=vmem_limit),
        cost_estimate=pl.CostEstimate(
            flops=B * C * HW, transcendentals=0,
            bytes_accessed=2 * B * C * HW * itemsize + B * C * 4),
    )(xr, g3)
    return out


def se_block(x, w1, b1, alpha, w2, b2, *, target_tile_bytes=4 << 20,
             force_split=False):
    """x: (B, C, H, W); w1: (Cr, C), b1: (Cr,), alpha: (1,), w2: (C, Cr),
    b2: (C,) — PyTorch Linear/PReLU parameter layouts."""
    B, C, H, W = x.shape
    HW = H * W
    Cr = w1.shape[0]
    itemsize = x.dtype.itemsize

    vmem_cap = _vmem_cap_bytes()
    max_tile = (vmem_cap - (2 << 20)) // 4       # 2x in + 2x out buffers + slack
    soft_target = min(target_tile_bytes, max_tile)
    per_image = C * HW * itemsize

    xr = x.reshape(B, C, HW)

    # ---- fallback: one image does not fit -> channel-split, two passes ----
    if force_split or per_image > max_tile:
        cblk = _choose_cblk(C, HW, itemsize, soft_target)
        tile_bytes = cblk * HW * itemsize
        vmem_limit = int(min(vmem_cap, max(32 << 20, 4 * tile_bytes + (4 << 20))))
        out = _se_block_split(xr, w1, b1, alpha, w2, b2,
                              cblk=cblk, vmem_limit=vmem_limit)
        return out.reshape(B, C, H, W)

    # ---- main fused path ----
    bblk = _choose_bblk(B, C, HW, itemsize, soft_target)
    if bblk is None:
        bblk = 1                                  # big image, but still fits
    grid = (B // bblk,)
    tile_bytes = bblk * per_image
    vmem_limit = int(min(vmem_cap, max(32 << 20, 4 * tile_bytes + (4 << 20))))

    w1t = w1.T                                    # (C, Cr)
    w2t = w2.T                                    # (Cr, C)
    b1r = b1.reshape(1, Cr).astype(jnp.float32)
    b2r = b2.reshape(1, C).astype(jnp.float32)
    alpha_s = alpha.reshape(1).astype(jnp.float32)

    param_bytes = (w1.size + w2.size + b1.size + b2.size + alpha.size) * 4
    cost = pl.CostEstimate(
        flops=2 * B * C * HW + 4 * B * C * Cr + B * C * HW,
        transcendentals=B * C,
        bytes_accessed=2 * B * C * HW * itemsize + param_bytes,
    )

    out = pl.pallas_call(
        se_block_kernel,
        out_shape=jax.ShapeDtypeStruct((B, C, HW), x.dtype),
        grid=grid,
        in_specs=[
            pl.BlockSpec((bblk, C, HW), lambda b: (b, 0, 0)),        # x tile
            pl.BlockSpec((C, Cr), lambda b: (0, 0)),                 # fc1 weight^T
            pl.BlockSpec((1, Cr), lambda b: (0, 0)),                 # fc1 bias
            pl.BlockSpec(memory_space=pltpu.MemorySpace.SMEM),       # PReLU slope
            pl.BlockSpec((Cr, C), lambda b: (0, 0)),                 # fc2 weight^T
            pl.BlockSpec((1, C), lambda b: (0, 0)),                  # fc2 bias
        ],
        out_specs=pl.BlockSpec((bblk, C, HW), lambda b: (b, 0, 0)),
        compiler_params=pltpu.CompilerParams(
            dimension_semantics=("parallel",),
            vmem_limit_bytes=vmem_limit,
        ),
        cost_estimate=cost,
    )(xr, w1t, b1r, alpha_s, w2t, b2r)
    return out.reshape(B, C, H, W)


def se_block_ref(x, w1, b1, alpha, w2, b2):
    """Pure-JAX reference mirroring the PyTorch forward."""
    y = x.mean(axis=(2, 3))                                      # (B, C)
    h = y @ w1.T + b1
    h = jnp.where(h > 0, h, alpha[0] * h)
    g = jax.nn.sigmoid(h @ w2.T + b2)
    return x * g[:, :, None, None]


if __name__ == "__main__":
    # Module config: channel=32, reduction=16 -> hidden=2
    B, C, H, W = 2, 32, 16, 16
    reduction = 16
    Cr = C // reduction

    key = jax.random.PRNGKey(0)
    kx, k1, kb1, k2, kb2 = jax.random.split(key, 5)

    x = jax.random.normal(kx, (B, C, H, W), dtype=jnp.float32)

    # Deterministic synthetic parameters (PyTorch Linear (out, in) layout).
    w1 = jax.random.normal(k1, (Cr, C), dtype=jnp.float32) * 0.1
    b1 = jax.random.normal(kb1, (Cr,), dtype=jnp.float32) * 0.1
    w2 = jax.random.normal(k2, (C, Cr), dtype=jnp.float32) * 0.1
    b2 = jax.random.normal(kb2, (C,), dtype=jnp.float32) * 0.1
    alpha = jnp.array([0.25], dtype=jnp.float32)                 # PReLU default init

    ref = se_block_ref(x, w1, b1, alpha, w2, b2)

    # Main fused path.
    out = jax.block_until_ready(se_block(x, w1, b1, alpha, w2, b2))
    assert out.shape == (B, C, H, W)
    assert jnp.allclose(out, ref, atol=1e-5, rtol=1e-5), "fused path mismatch"

    # Also exercise the channel-split fallback (used when one image's (C, HW)
    # slab is too big to double-buffer in VMEM, e.g. large maps on v7x).
    out_split = jax.block_until_ready(
        se_block(x, w1, b1, alpha, w2, b2,
                 target_tile_bytes=16 << 10, force_split=True))
    assert jnp.allclose(out_split, ref, atol=1e-5, rtol=1e-5), "split path mismatch"

    print("KERNEL_OK")
</pallas_src>

<mosaic_0001>
module attributes {stable_mosaic.version = 11 : i64} {
  func.func @se_block_kernel(%arg0: i32, %arg1: memref<1x32x256xf32, #tpu.memory_space<vmem>>, %arg2: memref<32x2xf32, #tpu.memory_space<vmem>>, %arg3: memref<1x2xf32, #tpu.memory_space<vmem>>, %arg4: memref<1xf32, #tpu.memory_space<smem>>, %arg5: memref<2x32xf32, #tpu.memory_space<vmem>>, %arg6: memref<1x32xf32, #tpu.memory_space<vmem>>, %arg7: memref<1x32x256xf32, #tpu.memory_space<vmem>>) attributes {dimension_semantics = [#tpu.dimension_semantics<parallel>], iteration_bounds = array<i64: 2>, scalar_prefetch = 0 : i64, scratch_operands = 0 : i64, tpu.core_type = #tpu.core_type<tc>, window_params = [{transform_indices = @transform_0, window_bounds = array<i64: 1, 32, 256>}, {pipeline_mode = #tpu.pipeline_mode<synchronous>, transform_indices = @transform_1, window_bounds = array<i64: 32, 2>}, {pipeline_mode = #tpu.pipeline_mode<synchronous>, transform_indices = @transform_2, window_bounds = array<i64: 1, 2>}, {transform_indices = @transform_3, window_bounds = array<i64: 1>}, {pipeline_mode = #tpu.pipeline_mode<synchronous>, transform_indices = @transform_4, window_bounds = array<i64: 2, 32>}, {pipeline_mode = #tpu.pipeline_mode<synchronous>, transform_indices = @transform_5, window_bounds = array<i64: 1, 32>}, {transform_indices = @transform_6, window_bounds = array<i64: 1, 32, 256>}]} {
    %c0 = arith.constant 0 : index
    %c0_0 = arith.constant 0 : index
    %c0_1 = arith.constant 0 : index
    %0 = vector.load %arg1[%c0, %c0_0, %c0_1] : memref<1x32x256xf32, #tpu.memory_space<vmem>>, vector<1x32x256xf32>
    %cst = arith.constant 1.000000e+00 : f32
    %1 = vector.broadcast %cst : f32 to vector<1x1x256xf32>
    "tpu.trace_start"() <{level = 10 : i32, message = "bqh,bch->bqc"}> : () -> ()
    %cst_2 = arith.constant dense<0.000000e+00> : vector<1x1x32xf32>
    %2 = tpu.matmul %1, %0, %cst_2 {dimension_numbers = #tpu.dot_dimension_numbers<[2], [2], [1], [1], [0, 0, 0, 1, 1, 1], [0], [0]>} : vector<1x1x256xf32>, vector<1x32x256xf32>, vector<1x1x32xf32> -> vector<1x1x32xf32>
    "tpu.trace_stop"() : () -> ()
    %3 = vector.shape_cast %2 : vector<1x1x32xf32> to vector<1x32xf32>
    %cst_3 = arith.constant 3.906250e-03 : f32
    %4 = vector.broadcast %cst_3 : f32 to vector<1x32xf32>
    %5 = arith.mulf %3, %4 : vector<1x32xf32>
    %c0_4 = arith.constant 0 : index
    %c0_5 = arith.constant 0 : index
    %6 = vector.load %arg2[%c0_4, %c0_5] : memref<32x2xf32, #tpu.memory_space<vmem>>, vector<32x2xf32>
    %cst_6 = arith.constant dense<0.000000e+00> : vector<1x2xf32>
    %7 = tpu.matmul %5, %6, %cst_6 {dimension_numbers = #tpu.dot_dimension_numbers<[1], [0], [0], [1], [0, 0, 1, 1], [], []>} : vector<1x32xf32>, vector<32x2xf32>, vector<1x2xf32> -> vector<1x2xf32>
    %c0_7 = arith.constant 0 : index
    %c0_8 = arith.constant 0 : index
    %8 = vector.load %arg3[%c0_7, %c0_8] : memref<1x2xf32, #tpu.memory_space<vmem>>, vector<1x2xf32>
    %9 = arith.addf %7, %8 : vector<1x2xf32>
    %c0_9 = arith.constant 0 : index
    %10 = memref.load %arg4[%c0_9] : memref<1xf32, #tpu.memory_space<smem>>
    %cst_10 = arith.constant 0.000000e+00 : f32
    %11 = vector.broadcast %cst_10 : f32 to vector<1x2xf32>
    %12 = arith.cmpf ogt, %9, %11 : vector<1x2xf32>
    %13 = vector.broadcast %10 : f32 to vector<1x2xf32>
    %14 = arith.mulf %13, %9 : vector<1x2xf32>
    %15 = arith.select %12, %9, %14 : vector<1x2xi1>, vector<1x2xf32>
    %c0_11 = arith.constant 0 : index
    %c0_12 = arith.constant 0 : index
    %16 = vector.load %arg5[%c0_11, %c0_12] : memref<2x32xf32, #tpu.memory_space<vmem>>, vector<2x32xf32>
    %cst_13 = arith.constant dense<0.000000e+00> : vector<1x32xf32>
    %17 = tpu.matmul %15, %16, %cst_13 {dimension_numbers = #tpu.dot_dimension_numbers<[1], [0], [0], [1], [0, 0, 1, 1], [], []>} : vector<1x2xf32>, vector<2x32xf32>, vector<1x32xf32> -> vector<1x32xf32>
    %c0_14 = arith.constant 0 : index
    %c0_15 = arith.constant 0 : index
    %18 = vector.load %arg6[%c0_14, %c0_15] : memref<1x32xf32, #tpu.memory_space<vmem>>, vector<1x32xf32>
    %19 = arith.addf %17, %18 : vector<1x32xf32>
    %20 = arith.negf %19 : vector<1x32xf32>
    %21 = math.exp %20 : vector<1x32xf32>
    %cst_16 = arith.constant 1.000000e+00 : f32
    %22 = vector.broadcast %cst_16 : f32 to vector<1x32xf32>
    %23 = arith.addf %22, %21 : vector<1x32xf32>
    %24 = arith.divf %22, %23 : vector<1x32xf32>
    %25 = vector.shape_cast %24 : vector<1x32xf32> to vector<1x32x1xf32>
    %26 = vector.broadcast %25 : vector<1x32x1xf32> to vector<1x32x256xf32>
    %27 = arith.mulf %0, %26 : vector<1x32x256xf32>
    %c0_17 = arith.constant 0 : index
    %c0_18 = arith.constant 0 : index
    %c0_19 = arith.constant 0 : index
    %28 = vector.load %arg7[%c0_17, %c0_18, %c0_19] : memref<1x32x256xf32, #tpu.memory_space<vmem>>, vector<1x32x256xf32>
    tpu.vector_store %arg7[%c0_17, %c0_18, %c0_19], %27 {strides = array<i32>} : memref<1x32x256xf32, #tpu.memory_space<vmem>>, vector<1x32x256xf32>,
    return
  }
  func.func @transform_0(%arg0: i32) -> (i32, i32, i32) {
    %c0_i32 = arith.constant 0 : i32
    %c0_i32_0 = arith.constant 0 : i32
    %c0_i32_1 = arith.constant 0 : i32
    return %arg0, %c0_i32, %c0_i32_0 : i32, i32, i32
  }
  func.func @transform_1(%arg0: i32) -> (i32, i32) {
    %c0_i32 = arith.constant 0 : i32
    %c0_i32_0 = arith.constant 0 : i32
    %c0_i32_1 = arith.constant 0 : i32
    return %c0_i32, %c0_i32_0 : i32, i32
  }
  func.func @transform_2(%arg0: i32) -> (i32, i32) {
    %c0_i32 = arith.constant 0 : i32
    %c0_i32_0 = arith.constant 0 : i32
    %c0_i32_1 = arith.constant 0 : i32
    return %c0_i32, %c0_i32_0 : i32, i32
  }
  func.func @transform_3(%arg0: i32) -> i32 {
    %c0_i32 = arith.constant 0 : i32
    %c0_i32_0 = arith.constant 0 : i32
    return %c0_i32 : i32
  }
  func.func @transform_4(%arg0: i32) -> (i32, i32) {
    %c0_i32 = arith.constant 0 : i32
    %c0_i32_0 = arith.constant 0 : i32
    %c0_i32_1 = arith.constant 0 : i32
    return %c0_i32, %c0_i32_0 : i32, i32
  }
  func.func @transform_5(%arg0: i32) -> (i32, i32) {
    %c0_i32 = arith.constant 0 : i32
    %c0_i32_0 = arith.constant 0 : i32
    %c0_i32_1 = arith.constant 0 : i32
    return %c0_i32, %c0_i32_0 : i32, i32
  }
  func.func @transform_6(%arg0: i32) -> (i32, i32, i32) {
    %c0_i32 = arith.constant 0 : i32
    %c0_i32_0 = arith.constant 0 : i32
    %c0_i32_1 = arith.constant 0 : i32
    return %arg0, %c0_i32, %c0_i32_0 : i32, i32, i32
  }
}

</mosaic_0001>

<bundles_post_ra>
// kernel: tpu_custom_call.1
= control target key start
LH: loop header
LB: loop body
LE: loop exit
PB: predicated region body
PF: predicated region fallthrough
CT: control target
= control target key end

     0   :  { %s1118_s0 = inlined_call_operand.hbm [shape: f32[2,32,256], index: 0, kind: input, shape index: {}]   ;;  %s1119_s1 = inlined_call_operand.vmem [shape: f32[32,2], index: 1, kind: input, shape index: {}]   ;;  %s1120_s2 = inlined_call_operand.vmem [shape: f32[1,2], index: 2, kind: input, shape index: {}]   ;;  %s1121_s3 = inlined_call_operand.<no memory space> [shape: f32[1], index: 3, kind: input, shape index: {}]   ;;  %s1122_s4 = inlined_call_operand.vmem [shape: f32[2,32], index: 4, kind: input, shape index: {}]   ;;  %s1123_s5 = inlined_call_operand.vmem [shape: f32[1,32], index: 5, kind: input, shape index: {}]   ;;  %s1124_s6 = inlined_call_operand.hbm [shape: f32[2,32,256], index: 6, kind: output, shape index: {}]  }
   0x1   :  { %11 = sst [smem:[#allocation2]] %s1121_s3 }
   0x2   :  { %12 = vsyncpa [#allocation4], 0 }
   0x3   :  { %14 = vsyncpa [#allocation4 + $0x1], 0 }
   0x4   :  { %15 = vsyncpa [#allocation5], 0 }
   0x5   :  { %17 = vsyncpa [#allocation5 + $0x1], 0  ;;  %s903_s23 = smov 0   ;;  %s905_s24 = smov 0  }
   0x6   :  { %s907_s25 = smov 0   ;;  %s909_s26 = smov 0  }
   0x7 LB: > { %s924_s3 = sadd.s32 4294967295, %s853_s26   ;;  %s642_s27 = sadd.s32 4294967294, %s853_s26   ;;  %s853_s26 = sphi %s909_s26, %s1137_s26   ;;  %s849_s25 = sphi %s907_s25, %s1136_s25   ;;  %s845_s24 = sphi %s905_s24, %s1135_s24   ;;  %s841_s23 = sphi %s903_s23, %s1134_s23  }
   0x8   : > { %s928_s28 = sadd.s32 1, %s853_s26   ;;  %s30_s29 = sadd.s32 1, %s849_s25 }
   0x9   : > { %s27_s30 = ssub.s32 %s853_s26, %s928_s28  ;;  %p37_p0 = scmp.ne.s32.totalorder %s849_s25, %s845_s24 }
   0xa   : > { %p28_p1 = scmp.eq.s32.totalorder %s27_s30, 0  ;;  %p38_p2 = scmp.eq.s32.totalorder %s853_s26, 0 }
   0xb   : > { %p43_p3 = scmp.ne.s32.totalorder %s845_s24, %s841_s23  ;;  %p44_p4 = scmp.eq.s32.totalorder %s924_s3, 0 }
   0xc   : > { %s940_s7 = scalar_select %p28_p1, %s849_s25, %s30_s29  }
   0xd   : > { %p942_p5 = por %p38_p2, %p37_p0  ;;  %p946_p6 = por %p44_p4, %p43_p3 }
   0xe   : > { %p172_p7 = scmp.eq.s32.totalorder %s924_s3, 1  ;;  %p178_p8 = scmp.eq.s32.totalorder %s642_s27, 1 }
   0xf   : > { %p711_p10 = scmp.lt.s32.totalorder %s853_s26, 2  ;;  %s213_s12 = sand.u32 1, %s849_s25  }
  0x10   : > { %p953_p11 = por %p172_p7, %p37_p0  ;;  %p957_p12 = por %p178_p8, %p43_p3 }
  0x11   : > { %s660_s13 = sshll.u32 %s853_s26, 10  ;;  %s645_s14 = sshll.u32 %s213_s12, 6 }
  0x12   : > { %s1128_s10 = scalar_select %p953_p11, 1, 0 }
  0x13   : > { %s1129_s11 = scalar_select %p957_p12, 1, 0 }
  0x14   : > { %s966_s17 = scalar_lea.hbm %s1118_s0, %s660_s13  ;;  %s217_s18 = scalar_lea.vmem [#allocation3], %s645_s14 }
  0x15   : > { %s224_s19 = sshll.u32 %s217_s18, 4  ;;  %p970_p13 = pnand %p711_p10, %p942_p5  ;;  %s974_s19 = int_to_ptr.vmem [resolvable:$true] %s224_s19 }
  0x16   : > { %s976_s21 = scalar_lea.sflag [#allocation4], %s213_s12  ;;  %s757_s22 = scalar_lea.hbm %s966_s17, 1024 }
  0x17   : > { %p758_p0 = scmp.ne.s32.totalorder %s966_s17, %s757_s22  ;;  %p759_p1 = pneg %p970_p13 }
  0x18   : > { %s762_s30 = scalar_lea.hbm %s1118_s0, 2048  ;;  %p763_p4 = scmp.lt.u32.totalorder %s966_s17, %s1118_s0 }
  0x19   : > { %p760_p2 = pnand %p759_p1, %p758_p0  ;;  %p764_p5 = scmp.lt.u32.totalorder %s762_s30, %s757_s22 }
  0x1a   : > { %p766_p8 = scmp.lt.u32.totalorder %s757_s22, %s966_s17 }
  0x1b   : > { %p761_p3 = pneg %p760_p2  ;;  %p765_p7 = por %p764_p5, %p763_p4 }
  0x1d   : > { %p767_p10 = por %p766_p8, %p765_p7 }
  0x1f   : > { %p768_p9 = pnand %p767_p10, %p761_p3 }
  0x21   : > { %771 = shalt.err (!%p768_p9)
}
  0x22   : > { %s772_s12 = scalar_lea.vmem %s974_s19, 1024  ;;  %s855_s14 = smov [#allocation3]  }
  0x23   : > { %p773_p0 = scmp.ne.s32.totalorder %s974_s19, %s772_s12  ;;  %s777_s15 = sshll.u32 %s855_s14, 4  ;;  %s778_s15 = int_to_ptr.vmem [resolvable:$false] %s777_s15 }
  0x24   : > { %s779_s16 = scalar_lea.vmem %s778_s15, 2048  ;;  %p780_p11 = scmp.lt.s32.totalorder %s974_s19, %s778_s15 }
  0x25   : > { %p775_p2 = pnand %p773_p0, %p759_p1  ;;  %p781_p4 = scmp.lt.s32.totalorder %s779_s16, %s772_s12 }
  0x27   : > { %p776_p12 = pneg %p775_p2  ;;  %p782_p5 = por %p781_p4, %p780_p11 }
  0x29   : > { %p783_p7 = pnand %p782_p5, %p776_p12 }
  0x2b   : > { %786 = shalt.err (!%p783_p7)
}
  0x2c   : > { %s856_s18 = smov 256   ;;  %s857_s22 = smov 16  }
  0x2d   : > { %706 = dma.hbm_to_vmem [thread:$0]  (!%p970_p13), %s966_s17, 1024, %s974_s19, %s976_s21, %s856_s18, %s856_s18, %s857_s22  }
  0x2e   : > { %p648_p9 = scmp.ge.s32.totalorder %s853_s26, 1  ;;  %p232_p1 = scmp.lt.s32.totalorder %s853_s26, 3 }
  0x30   : > { %p233_p3 = pnand %p648_p9, %p232_p1 }
  0x31   : > { %s1007_s27 = sand.u32 (!%p233_p3), 1, %s845_s24  }
  0x32   : > { %236 = sbr.rel (%p233_p3) target bundleno = 887 (0x377), region = 44  ;;  %s649_s29 = sshll.u32 (!%p233_p3), %s1007_s27, 6 }
  0x33   : > { %s239_s30 = scalar_lea.sflag (!%p233_p3), [#allocation4], %s1007_s27  ;;  %s242_s8 = scalar_lea.vmem (!%p233_p3), [#allocation3], %s649_s29 }
  0x39   : > { %832 = dma.done.wait (%p946_p6), %s239_s30, 1024  }
  0x3a   : > { %834 = vsyncadd (%p946_p6), %s239_s30, 4294966272  ;;  %v858_v0 = vmov 1.0   ;;  %v859_v1 = vmov 0.0|0.0   ;;  %v1017_v2 = vld [vmem:[%s242_s8 + $0x8] sm:$0xff]  ;;  %v1019_v3 = vld [vmem:[%s242_s8 + $0x18] sm:$0xff]  ;;  %vm860_vm0 = vmmov 0   ;;  %v520_v39 = vlaneseq }
  0x3b   : > { %343 = vmatprep.mubr.f32.mxu0 %v858_v0  ;;  %693 = vmatprep.subr.bf16.mxu1 %v859_v1  ;;  %v1021_v4 = vld [vmem:[%s242_s8] sm:$0xff]  ;;  %v685_v5 = vpack.c.bf16 %v1019_v3, %v1017_v2  ;;  %v1025_v6 = vld [vmem:[%s242_s8 + $0x10] sm:$0xff]  ;;  %v1027_v7 = vld [vmem:[%s242_s8 + $0x28] sm:$0xff]  ;;  %v861_v20 = vmov 0.0   ;;  %vm355_vm1 = vcmask 261120   ;;  %vm440_vm2 = vcmask 1041408  }
  0x3c   : > { %v1029_v8 = vld [vmem:[%s242_s8 + $0x38] sm:$0xff]  ;;  %v687_v9 = vpack.c.bf16 %v1025_v6, %v1021_v4  ;;  %v350_v11 = vld [vmem:[%s1119_s1] sm:$0xff]  ;;  %v351_v12 = vld [vmem:[%s1119_s1 + $0x8] sm:$0xff]  ;;  %677 = vmatprep.mubr.msk.f32.mxu1 %vm860_vm0, %v861_v20  ;;  %s429_s18 = sld [smem:[#allocation2]]  ;;  %vm436_vm4 = vcmask 15360   ;;  %v521_v40 = vshrl.u32 %v520_v39, 7 }
  0x3d   : > { %v689_v10 = vpack.c.bf16 %v1029_v8, %v1027_v7  ;;  %686 = vmatprep.subr.bf16.mxu0 %v685_v5  ;;  %v694_v13 = vpack.c.bf16 %v351_v12, %v350_v11  ;;  %v275_v14 = vld [vmem:[%s242_s8 + $0x20] sm:$0xff]  ;;  %v1041_v15 = vld [vmem:[%s242_s8 + $0x30] sm:$0xff]  ;;  %v353_v18 = vld [vmem:[%s1119_s1 + $0x18] sm:$0xff]  ;;  %s270_s17 = scalar_lea.vmem [#allocation6], %s649_s29  ;;  %s661_s20 = sshll.u32 %s924_s3, 10 }
  0x3e   : > { %688 = vmatpush1.bf16.xpose.msra.mxu0 %v687_v9  ;;  %v691_v16 = vpack.c.bf16 %v1041_v15, %v275_v14  ;;  %v352_v17 = vld [vmem:[%s1119_s1 + $0x10] sm:$0xff]  ;;  %v434_v24 = vld [vmem:[%s1122_s4] sm:$0x3]  ;;  %v522_v41 = vsub.s32 0, %v521_v40  ;;  %s569_s19 = sshll.u32 %s270_s17, 4  ;;  %s1070_s13 = scalar_lea.hbm %s1124_s6, %s661_s20  ;;  %s1065_s19 = int_to_ptr.vmem [resolvable:$true] %s569_s19 }
  0x3f   : > { %690 = vmatprep.subr.bf16.mxu0 %v689_v10  ;;  %695 = vmatpush3.bf16.msra.mxu1 %v694_v13  ;;  %v697_v19 = vpack.c.bf16 %v353_v18, %v352_v17  ;;  %v354_v25 = vld [vmem:[%s1120_s2] sm:$0x1]  ;;  %s556_s3 = scalar_lea.sflag [#allocation5], %s1007_s27  ;;  %s787_s12 = scalar_lea.vmem %s1065_s19, 1024 }
  0x40   : > { %696 = vmatprep.subr.bf16.mxu1 %v859_v1  ;;  %v435_v32 = vld [vmem:[%s1123_s5] sm:$0x1]  ;;  %p788_p6 = scmp.ne.s32.totalorder %s1065_s19, %s787_s12  ;;  %p1131_p11 = scmp.ne.s32.totalorder %s1128_s10, 0 }
  0x41   : > { %s862_s14 = smov [#allocation6]  }
  0x42   : > { %v431_v27 = vstv %s429_s18  ;;  %p789_p12 = pnand %p788_p6, %p1131_p11  ;;  %s791_s15 = sshll.u32 %s862_s14, 4  ;;  %s792_s15 = int_to_ptr.vmem [resolvable:$false] %s791_s15 }
  0x43   : > { %698 = vmatpush3.bf16.msra.mxu1 %v697_v19  ;;  %s793_s16 = scalar_lea.vmem %s792_s15, 2048  ;;  %p794_p8 = scmp.lt.s32.totalorder %s1065_s19, %s792_s15 }
  0x44   : > { %680 = vmatprep.subr.mxu1 %v861_v20  ;;  %p790_p13 = pneg %p789_p12  ;;  %p795_p10 = scmp.lt.s32.totalorder %s793_s16, %s787_s12 }
  0x46   : > { %692 = vmatpush1.bf16.xpose.msra.mxu0 %v691_v16  ;;  %p796_p0 = por %p795_p10, %p794_p8 }
  0x48   : > { %p797_p2 = pnand %p796_p0, %p790_p13 }
  0x4d   : > { %344 = vmatmul.mubr.f32.vlgmr.msra.gmra.mrb[0].mxu0 %v858_v0 }
 0x120   : > { %v345_v21 = vpop.f32.mrb[0].mxu0 }
 0x121   : > { %v349_v22 = vmul.f32 0.00390625, %v345_v21  ;;  %v347_v23 = vpop.f32.mrb[1].mxu0 }
 0x123   : > { %678 = vmatmul.mubr.msk.f32.vlgmr.msra.gmra.mrb[0].mxu1 %vm355_vm1, %v349_v22 }
 0x124   : > { %682 = vmatprep.mubr.msk.f32.mxu1 %vm860_vm0, %v861_v20  ;;  %681 = vmatpush3.msk.msra.mxu1 %vm440_vm2, %v434_v24 }
 0x1f6   : > { %v425_v26 = vpop.f32.mrb[0].mxu1 }
 0x1f7   : > { %v426_v28 = vadd.f32 %v425_v26, %v354_v25  ;;  %v679_v29 = vpop.f32.mrb[1].mxu1 }
 0x1f9   : > { %vm430_vm3 = vcmp.gt.f32.partialorder %v426_v28, 0.0  ;;  %v432_v30 = vmul.f32 %v431_v27, %v426_v28 }
 0x1fb   : > { %v433_v31 = vsel %vm430_vm3, %v426_v28, %v432_v30 }
 0x1fc   : > { %683 = vmatmul.mubr.msk.f32.vlgmr.msra.gmra.mrb[2].mxu1 %vm436_vm4, %v433_v31 }
 0x2cf   : > { %v510_v33 = vpop.f32.mrb[2].mxu1 }
 0x2d0   : > { %v511_v34 = vadd.f32 %v510_v33, %v435_v32  ;;  %v684_v35 = vpop.f32.mrb[3].mxu1 }
 0x2d2   : > { %v654_v36 = vmul.f32 -1.442695, %v511_v34 }
 0x2d4   : > { %753 = vpow2.f32 %v654_v36 }
 0x2de   : > { %v754_v37 = vpop.eup %753 }
 0x2df   : > { %v517_v38 = vadd.f32 1.0, %v754_v37 }
 0x2e1   : > { %755 = vrcp.f32 %v517_v38 }
 0x2eb   : > { %v756_v42 = vpop.eup %755 }
 0x2ec   : > { %v523_v43 = vrot.slane %v756_v42, %v522_v41 }
 0x2ee   : > { %533 = vbcast.lane.b32.xlu1 %v523_v43, 272  ;;  %525 = vbcast.lane.b32.xlu0 %v523_v43, 256 }
 0x2f2   : > { %537 = vbcast.lane.b32.xlu1 %v523_v43, 280  ;;  %529 = vbcast.lane.b32.xlu0 %v523_v43, 264 }
 0x360   : > { %v534_v44 = vpop.permute.xlu1 %533  ;;  %v526_v45 = vpop.permute.xlu0 %525 }
 0x361   : > { %v543_v46 = vmul.f32 %v534_v44, %v275_v14  ;;  %v544_v47 = vmul.f32 %v534_v44, %v1027_v7  ;;  %v539_v48 = vmul.f32 %v526_v45, %v1021_v4  ;;  %v540_v49 = vmul.f32 %v526_v45, %v1017_v2 }
 0x363   : > { %551 = vst [vmem:[%s270_s17 + $0x20] sm:$0xff] %v543_v46  ;;  %552 = vst [vmem:[%s270_s17 + $0x28] sm:$0xff] %v544_v47 }
 0x364   : > { %547 = vst [vmem:[%s270_s17] sm:$0xff] %v539_v48  ;;  %548 = vst [vmem:[%s270_s17 + $0x8] sm:$0xff] %v540_v49  ;;  %v538_v50 = vpop.permute.xlu1 %537  ;;  %v530_v51 = vpop.permute.xlu0 %529 }
 0x365   : > { %v545_v52 = vmul.f32 %v538_v50, %v1041_v15  ;;  %v546_v53 = vmul.f32 %v538_v50, %v1029_v8  ;;  %v541_v54 = vmul.f32 %v530_v51, %v1025_v6  ;;  %v542_v55 = vmul.f32 %v530_v51, %v1019_v3 }
 0x367   : > { %553 = vst [vmem:[%s270_s17 + $0x30] sm:$0xff] %v545_v52  ;;  %554 = vst [vmem:[%s270_s17 + $0x38] sm:$0xff] %v546_v53 }
 0x368   : > { %549 = vst [vmem:[%s270_s17 + $0x10] sm:$0xff] %v541_v54  ;;  %550 = vst [vmem:[%s270_s17 + $0x18] sm:$0xff] %v542_v55 }
 0x369   : > { %800 = shalt.err (!%p797_p2)
}
 0x36a   : > { %s801_s18 = scalar_lea.hbm %s1070_s13, 1024  ;;  %s805_s8 = scalar_lea.hbm %s1124_s6, 2048 }
 0x36b   : > { %p802_p4 = scmp.ne.s32.totalorder %s1070_s13, %s801_s18  ;;  %p806_p9 = scmp.lt.u32.totalorder %s1070_s13, %s1124_s6 }
 0x36c   : > { %p807_p1 = scmp.lt.u32.totalorder %s805_s8, %s801_s18  ;;  %p809_p6 = scmp.lt.u32.totalorder %s801_s18, %s1070_s13 }
 0x36d   : > { %p803_p5 = pnand %p802_p4, %p1131_p11 }
 0x36e   : > { %p808_p3 = por %p807_p1, %p806_p9 }
 0x36f   : > { %p804_p7 = pneg %p803_p5 }
 0x370   : > { %p810_p12 = por %p809_p6, %p808_p3 }
 0x372   : > { %p811_p13 = pnand %p810_p12, %p804_p7 }
 0x374   : > { %814 = shalt.err (!%p811_p13)
}
 0x375   : > { %s863_s20 = smov 256   ;;  %s864_s29 = smov 16  }
 0x376   : > { %701 = dma.vmem_to_hbm [thread:$0]  (%p1131_p11), %s1065_s19, 1024, %s1070_s13, %s556_s3, %s863_s20, %s863_s20, %s864_s29  }
 0x377 PF: > { %s584_s21 = sand.u32 1, %s841_s23   ;;  %p1132_p8 = scmp.ne.s32.totalorder %s1129_s11, 0 }
 0x378   : > { %p1133_p10 = scmp.ge.s32.totalorder %s853_s26, 2  ;;  %s585_s12 = scalar_lea.sflag [#allocation5], %s584_s21 }
 0x37a   : > { %p708_p0 = pnand %p1133_p10, %p1132_p8 }
 0x37c   : > { %836 = dma.done.wait (!%p708_p0), %s585_s12, 1024  }
 0x37d   : > { %838 = vsyncadd (!%p708_p0), %s585_s12, 4294966272  ;;  %p20_p2 = scmp.ge.s32.totalorder %s928_s28, 4   ;;  %s1134_s23 = smov %s845_s24 }
 0x37e   : > { %s1135_s24 = smov %s849_s25  ;;  %s1136_s25 = smov %s940_s7 }
 0x37f   : > { %s1137_s26 = smov %s928_s28  ;;  %22 = sbr.rel (!%p20_p2) target bundleno = 7 (0x7), region = 89 }
 0x386   :  { %590 = vsyncpa [#allocation4], 1 }
 0x387   :  { %592 = vsyncpa [#allocation4 + $0x1], 1 }
 0x388   :  { %593 = vsyncpa [#allocation5], 1 }
 0x389   :  { %595 = vsyncpa [#allocation5 + $0x1], 1 }

</bundles_post_ra>
